<compile_context>
chip_gen: v5e
topology: v5e:2x2
jax: 0.10.0
libtpu: 0.0.40
codegen_flags: <defaults>
</compile_context>

<pallas_src>
import jax
import jax.numpy as jnp
from jax.experimental import pallas as pl
from jax.experimental.pallas import tpu as pltpu


def _round_up(v, m):
    return (v + m - 1) // m * m


def highway_kernel(x_ref, wf_ref, bf_ref, o_ref):
    """One row-tile of the highway forward.

    x_ref : [tm, Dp]     input rows (native dtype)
    wf_ref: [Dp, 2*Dp]   fused [W1^T | W2^T]
    bf_ref: [1, 2*Dp]    fused [b1 | b2]
    o_ref : [tm, Dp]     output rows
    """
    Dp = o_ref.shape[-1]
    x = x_ref[...]

    # Single fused MXU pass: [tm, Dp] @ [Dp, 2*Dp] -> [tm, 2*Dp], f32 accumulate.
    xx = jnp.dot(x, wf_ref[...], preferred_element_type=jnp.float32)
    xx = xx + bf_ref[...].astype(jnp.float32)

    x1 = xx[:, :Dp]   # W1 branch
    x2 = xx[:, Dp:]   # W2 branch (gate)

    g = jax.nn.sigmoid(x2)                 # exp/recip go to the EUP slot
    xf = x.astype(jnp.float32)
    # g * relu(x1) + (1 - g) * x  ==  x + g * (relu(x1) - x)
    y = xf + g * (jnp.maximum(x1, 0.0) - xf)
    o_ref[...] = y.astype(o_ref.dtype)


def highway_forward(x, w1, b1, w2, b2, *, tm=256):
    """x: [..., D]; w1, w2: [D, D] (PyTorch Linear weight layout); b1, b2: [D]."""
    orig_shape = x.shape
    D = orig_shape[-1]
    x2d = x.reshape(-1, D)
    M = x2d.shape[0]

    # Lane-dense feature dim: pad D to a multiple of 128 so output stores are
    # full-vreg `vst` instead of masked partial stores.
    Dp = _round_up(D, 128)

    w1t = w1.T
    w2t = w2.T
    if Dp != D:
        pad_w = ((0, Dp - D), (0, Dp - D))
        w1t = jnp.pad(w1t, pad_w)
        w2t = jnp.pad(w2t, pad_w)
        b1 = jnp.pad(b1, (0, Dp - D))
        b2 = jnp.pad(b2, (0, Dp - D))
        x2d = jnp.pad(x2d, ((0, 0), (0, Dp - D)))

    wf = jnp.concatenate([w1t, w2t], axis=1)                  # [Dp, 2*Dp]
    bf = jnp.concatenate([b1, b2], axis=0).reshape(1, 2 * Dp)  # [1, 2*Dp]

    # Row tile: big enough to feed the MXU and amortize ~0.35us/grid-step,
    # clamped to the problem size, multiple of 8.  No host-side row padding:
    # cdiv grid + Pallas ragged last block cover M % tm != 0.
    tm = max(8, _round_up(tm, 8))
    tm_eff = min(tm, _round_up(M, 8))
    grid = (pl.cdiv(M, tm_eff),)

    # Rough VMEM requirement: double-buffered x/out tiles + fused weights/bias
    # + in-kernel f32 intermediates.  Only raise the scoped limit if needed,
    # and never above 64 MiB (v7x physical VMEM).
    x_isz = jnp.dtype(x.dtype).itemsize
    w_isz = jnp.dtype(wf.dtype).itemsize
    est = (2 * tm_eff * Dp * x_isz            # x tiles (double-buffered)
           + 2 * tm_eff * Dp * x_isz          # out tiles (double-buffered)
           + 2 * (Dp * 2 * Dp + 2 * Dp) * w_isz   # fused weights + bias
           + 3 * tm_eff * 2 * Dp * 4)         # f32 intermediates
    vmem_limit = None
    if est > 30 * 1024 * 1024:
        vmem_limit = min(_round_up(est, 1 << 20), 64 * 1024 * 1024)

    out = pl.pallas_call(
        highway_kernel,
        out_shape=jax.ShapeDtypeStruct((M, Dp), x.dtype),
        grid_spec=pltpu.PrefetchScalarGridSpec(
            num_scalar_prefetch=0,
            grid=grid,
            in_specs=[
                pl.BlockSpec((tm_eff, Dp), lambda i: (i, 0)),   # x row tile
                pl.BlockSpec((Dp, 2 * Dp), lambda i: (0, 0)),   # [W1^T | W2^T]
                pl.BlockSpec((1, 2 * Dp), lambda i: (0, 0)),    # [b1 | b2]
            ],
            out_specs=pl.BlockSpec((tm_eff, Dp), lambda i: (i, 0)),
        ),
        compiler_params=pltpu.CompilerParams(
            dimension_semantics=("parallel",),
            vmem_limit_bytes=vmem_limit,
        ),
    )(x2d, wf, bf)

    if Dp != D:
        out = out[:, :D]
    return out.reshape(orig_shape)


def reference_forward(x, w1, b1, w2, b2):
    x1 = jnp.einsum("...d,ed->...e", x, w1) + b1
    x2 = jnp.einsum("...d,ed->...e", x, w2) + b2
    g = jax.nn.sigmoid(x2)
    return g * jnp.maximum(x1, 0.0) + (1.0 - g) * x


if __name__ == "__main__":
    key = jax.random.PRNGKey(0)
    k_x, k_w1, k_w2, k_b2 = jax.random.split(key, 4)

    B, S, D = 2, 8, 32  # x: [batch, seq, size]
    x = jax.random.normal(k_x, (B, S, D), dtype=jnp.float32)

    # Deterministic parameter init (PyTorch Linear-like uniform bound).
    bound = 1.0 / (D ** 0.5)
    w1 = jax.random.uniform(k_w1, (D, D), minval=-bound, maxval=bound, dtype=jnp.float32)
    b1 = jnp.zeros((D,), dtype=jnp.float32)  # module sets W1.bias to 0
    w2 = jax.random.uniform(k_w2, (D, D), minval=-bound, maxval=bound, dtype=jnp.float32)
    b2 = jax.random.uniform(k_b2, (D,), minval=-bound, maxval=bound, dtype=jnp.float32)

    y = highway_forward(x, w1, b1, w2, b2)
    y = jax.block_until_ready(y)

    y_ref = reference_forward(x, w1, b1, w2, b2)
    assert y.shape == x.shape
    assert jnp.allclose(y, y_ref, atol=1e-5, rtol=1e-5), "mismatch vs reference"

    print("KERNEL_OK")
</pallas_src>

<mosaic_0001>
module attributes {stable_mosaic.version = 11 : i64} {
  func.func @highway_kernel(%arg0: i32, %arg1: memref<16x128xf32, #tpu.memory_space<vmem>>, %arg2: memref<128x256xf32, #tpu.memory_space<vmem>>, %arg3: memref<1x256xf32, #tpu.memory_space<vmem>>, %arg4: memref<16x128xf32, #tpu.memory_space<vmem>>) attributes {dimension_semantics = [#tpu.dimension_semantics<parallel>], iteration_bounds = array<i64: 1>, scalar_prefetch = 0 : i64, scratch_operands = 0 : i64, tpu.core_type = #tpu.core_type<tc>, window_params = [{transform_indices = @transform_0, window_bounds = array<i64: 16, 128>}, {pipeline_mode = #tpu.pipeline_mode<synchronous>, transform_indices = @transform_1, window_bounds = array<i64: 128, 256>}, {pipeline_mode = #tpu.pipeline_mode<synchronous>, transform_indices = @transform_2, window_bounds = array<i64: 1, 256>}, {transform_indices = @transform_3, window_bounds = array<i64: 16, 128>}]} {
    %c0 = arith.constant 0 : index
    %c0_0 = arith.constant 0 : index
    %0 = vector.load %arg1[%c0, %c0_0] : memref<16x128xf32, #tpu.memory_space<vmem>>, vector<16x128xf32>
    %c0_1 = arith.constant 0 : index
    %c0_2 = arith.constant 0 : index
    %1 = vector.load %arg2[%c0_1, %c0_2] : memref<128x256xf32, #tpu.memory_space<vmem>>, vector<128x256xf32>
    %cst = arith.constant dense<0.000000e+00> : vector<16x256xf32>
    %2 = tpu.matmul %0, %1, %cst {dimension_numbers = #tpu.dot_dimension_numbers<[1], [0], [0], [1], [0, 0, 1, 1], [], []>} : vector<16x128xf32>, vector<128x256xf32>, vector<16x256xf32> -> vector<16x256xf32>
    %c0_3 = arith.constant 0 : index
    %c0_4 = arith.constant 0 : index
    %3 = vector.load %arg3[%c0_3, %c0_4] : memref<1x256xf32, #tpu.memory_space<vmem>>, vector<1x256xf32>
    %4 = vector.broadcast %3 : vector<1x256xf32> to vector<16x256xf32>
    %5 = arith.addf %2, %4 : vector<16x256xf32>
    %6 = vector.extract_strided_slice %5 {offsets = [0, 0], sizes = [16, 128], strides = [1, 1]} : vector<16x256xf32> to vector<16x128xf32>
    %7 = vector.extract_strided_slice %5 {offsets = [0, 128], sizes = [16, 128], strides = [1, 1]} : vector<16x256xf32> to vector<16x128xf32>
    %8 = arith.negf %7 : vector<16x128xf32>
    %9 = math.exp %8 : vector<16x128xf32>
    %cst_5 = arith.constant 1.000000e+00 : f32
    %10 = vector.broadcast %cst_5 : f32 to vector<16x128xf32>
    %11 = arith.addf %10, %9 : vector<16x128xf32>
    %12 = arith.divf %10, %11 : vector<16x128xf32>
    %cst_6 = arith.constant 0.000000e+00 : f32
    %13 = vector.broadcast %cst_6 : f32 to vector<16x128xf32>
    %14 = arith.maximumf %6, %13 : vector<16x128xf32>
    %15 = arith.subf %14, %0 : vector<16x128xf32>
    %16 = arith.mulf %12, %15 : vector<16x128xf32>
    %17 = arith.addf %0, %16 : vector<16x128xf32>
    %c0_7 = arith.constant 0 : index
    %c0_8 = arith.constant 0 : index
    %18 = vector.load %arg4[%c0_7, %c0_8] : memref<16x128xf32, #tpu.memory_space<vmem>>, vector<16x128xf32>
    tpu.vector_store %arg4[%c0_7, %c0_8], %17 {strides = array<i32>} : memref<16x128xf32, #tpu.memory_space<vmem>>, vector<16x128xf32>,
    return
  }
  func.func @transform_0(%arg0: i32) -> (i32, i32) {
    %c0_i32 = arith.constant 0 : i32
    %c0_i32_0 = arith.constant 0 : i32
    return %arg0, %c0_i32 : i32, i32
  }
  func.func @transform_1(%arg0: i32) -> (i32, i32) {
    %c0_i32 = arith.constant 0 : i32
    %c0_i32_0 = arith.constant 0 : i32
    %c0_i32_1 = arith.constant 0 : i32
    return %c0_i32, %c0_i32_0 : i32, i32
  }
  func.func @transform_2(%arg0: i32) -> (i32, i32) {
    %c0_i32 = arith.constant 0 : i32
    %c0_i32_0 = arith.constant 0 : i32
    %c0_i32_1 = arith.constant 0 : i32
    return %c0_i32, %c0_i32_0 : i32, i32
  }
  func.func @transform_3(%arg0: i32) -> (i32, i32) {
    %c0_i32 = arith.constant 0 : i32
    %c0_i32_0 = arith.constant 0 : i32
    return %arg0, %c0_i32 : i32, i32
  }
}

</mosaic_0001>

<bundles_post_ra>
// kernel: tpu_custom_call.1
= control target key start
LH: loop header
LB: loop body
LE: loop exit
PB: predicated region body
PF: predicated region fallthrough
CT: control target
= control target key end

     0   :  { %8 = vsyncpa [#allocation3], 0  ;;  %s424_s0 = inlined_call_operand.hbm [shape: f32[16,128], index: 0, kind: input, shape index: {}]   ;;  %s425_s1 = inlined_call_operand.hbm [shape: f32[128,256], index: 1, kind: input, shape index: {}]   ;;  %s426_s2 = inlined_call_operand.hbm [shape: f32[1,256], index: 2, kind: input, shape index: {}]   ;;  %s427_s3 = inlined_call_operand.hbm [shape: f32[16,128], index: 3, kind: output, shape index: {}]  }
   0x1   :  { %9 = vsyncpa [#allocation6], 0  ;;  %s28_s14 = sshll.u32 %s425_s1, 4  ;;  %s29_s14 = int_to_ptr.hbm [resolvable:$true] %s28_s14 }
   0x2   :  { %10 = vsyncpa [#allocation4], 0  ;;  %s366_s15 = smov [#allocation5]   ;;  %s15_s19 = sshll.u32 %s424_s0, 4  ;;  %s16_s19 = int_to_ptr.hbm [resolvable:$true] %s15_s19 }
   0x3   :  { %s30_s16 = sshll.u32 %s366_s15, 4  ;;  %s367_s20 = smov 256   ;;  %s31_s16 = int_to_ptr.vmem [resolvable:$true] %s30_s16 }
   0x4   :  { %s368_s21 = smov 16   ;;  %s369_s22 = smov [#allocation2]  }
   0x5   :  { %36 = dma.hbm_to_vmem [thread:$0]  %s29_s14, 4096, %s31_s16, [#allocation6], %s367_s20, %s367_s20, %s368_s21  }
   0x6   :  { %s17_s23 = sshll.u32 %s369_s22, 4  ;;  %s370_s24 = smov 128   ;;  %s18_s23 = int_to_ptr.vmem [resolvable:$true] %s17_s23 }
   0x7   :  { %s371_s25 = smov 8   ;;  %s42_s27 = sshll.u32 %s426_s2, 4  ;;  %s43_s27 = int_to_ptr.hbm [resolvable:$true] %s42_s27 }
   0x8   :  { %23 = dma.hbm_to_vmem [thread:$0]  %s16_s19, 256, %s18_s23, [#allocation3], %s370_s24, %s370_s24, %s371_s25  }
   0x9   :  { %s372_s28 = smov [#allocation7]  }
   0xa   :  { %s44_s0 = sshll.u32 %s372_s28, 4  ;;  %s45_s0 = int_to_ptr.vmem [resolvable:$true] %s44_s0 }
   0xb   :  { %47 = dma.hbm_to_vmem [thread:$0]  %s43_s27, 32, %s45_s0, [#allocation6]  }
   0xc   :  { %360 = dma.done.wait [#allocation3], 256  }
   0xd   :  { %361 = vsyncadd [#allocation3], 4294967040 }
   0xe   :  { %362 = dma.done.wait [#allocation6], 4128  }
   0xf   :  { %363 = vsyncadd [#allocation6], 4294963168  ;;  %v93_v0 = vld [vmem:[#allocation5 + $0xf8] sm:$0xff]  ;;  %v91_v1 = vld [vmem:[#allocation5 + $0xe8] sm:$0xff]  ;;  %s373_s2 = smov [#allocation8]   ;;  %s200_s5 = sshll.u32 %s427_s3, 4  ;;  %s201_s5 = int_to_ptr.hbm [resolvable:$true] %s200_s5 }
  0x10   :  { %123 = vmatpush.msra.mxu1 %v93_v0  ;;  %232 = vmatpush.msra.mxu3 %v93_v0  ;;  %v89_v2 = vld [vmem:[#allocation5 + $0xd8] sm:$0xff]  ;;  %v87_v3 = vld [vmem:[#allocation5 + $0xc8] sm:$0xff]  ;;  %v92_v4 = vld [vmem:[#allocation5 + $0xf0] sm:$0xff]  ;;  %s198_s29 = sshll.u32 %s373_s2, 4  ;;  %s199_s29 = int_to_ptr.vmem [resolvable:$true] %s198_s29 }
  0x11   :  { %v90_v5 = vld [vmem:[#allocation5 + $0xe0] sm:$0xff]  ;;  %v85_v6 = vld [vmem:[#allocation5 + $0xb8] sm:$0xff]  ;;  %100 = vmatpush.msra.mxu0 %v92_v4  ;;  %216 = vmatpush.msra.mxu2 %v92_v4  ;;  %v88_v7 = vld [vmem:[#allocation5 + $0xd0] sm:$0xff] }
  0x12   :  { %124 = vmatpush.msra.mxu1 %v91_v1  ;;  %233 = vmatpush.msra.mxu3 %v91_v1  ;;  %v83_v8 = vld [vmem:[#allocation5 + $0xa8] sm:$0xff]  ;;  %v86_v9 = vld [vmem:[#allocation5 + $0xc0] sm:$0xff]  ;;  %v81_v10 = vld [vmem:[#allocation5 + $0x98] sm:$0xff] }
  0x13   :  { %101 = vmatpush.msra.mxu0 %v90_v5  ;;  %217 = vmatpush.msra.mxu2 %v90_v5  ;;  %v84_v11 = vld [vmem:[#allocation5 + $0xb0] sm:$0xff]  ;;  %v79_v12 = vld [vmem:[#allocation5 + $0x88] sm:$0xff]  ;;  %v82_v13 = vld [vmem:[#allocation5 + $0xa0] sm:$0xff] }
  0x14   :  { %125 = vmatpush.msra.mxu1 %v89_v2  ;;  %234 = vmatpush.msra.mxu3 %v89_v2  ;;  %v77_v14 = vld [vmem:[#allocation5 + $0x78] sm:$0xff]  ;;  %v80_v15 = vld [vmem:[#allocation5 + $0x90] sm:$0xff]  ;;  %v75_v16 = vld [vmem:[#allocation5 + $0x68] sm:$0xff] }
  0x15   :  { %102 = vmatpush.msra.mxu0 %v88_v7  ;;  %218 = vmatpush.msra.mxu2 %v88_v7  ;;  %v78_v17 = vld [vmem:[#allocation5 + $0x80] sm:$0xff]  ;;  %v73_v18 = vld [vmem:[#allocation5 + $0x58] sm:$0xff]  ;;  %v76_v19 = vld [vmem:[#allocation5 + $0x70] sm:$0xff] }
  0x16   :  { %126 = vmatpush.msra.mxu1 %v87_v3  ;;  %235 = vmatpush.msra.mxu3 %v87_v3  ;;  %v71_v20 = vld [vmem:[#allocation5 + $0x48] sm:$0xff]  ;;  %v74_v21 = vld [vmem:[#allocation5 + $0x60] sm:$0xff]  ;;  %v69_v22 = vld [vmem:[#allocation5 + $0x38] sm:$0xff] }
  0x17   :  { %103 = vmatpush.msra.mxu0 %v86_v9  ;;  %219 = vmatpush.msra.mxu2 %v86_v9  ;;  %v72_v23 = vld [vmem:[#allocation5 + $0x50] sm:$0xff]  ;;  %v67_v24 = vld [vmem:[#allocation5 + $0x28] sm:$0xff]  ;;  %v70_v25 = vld [vmem:[#allocation5 + $0x40] sm:$0xff] }
  0x18   :  { %127 = vmatpush.msra.mxu1 %v85_v6  ;;  %236 = vmatpush.msra.mxu3 %v85_v6  ;;  %v65_v26 = vld [vmem:[#allocation5 + $0x18] sm:$0xff]  ;;  %v68_v27 = vld [vmem:[#allocation5 + $0x30] sm:$0xff]  ;;  %v63_v28 = vld [vmem:[#allocation5 + $0x8] sm:$0xff] }
  0x19   :  { %104 = vmatpush.msra.mxu0 %v84_v11  ;;  %220 = vmatpush.msra.mxu2 %v84_v11  ;;  %v406_v29 = vld [vmem:[#allocation2] sm:$0xff]  ;;  %v408_v30 = vld [vmem:[#allocation2 + $0x8] sm:$0xff]  ;;  %v66_v31 = vld [vmem:[#allocation5 + $0x20] sm:$0xff] }
  0x1a   :  { %128 = vmatpush.msra.mxu1 %v83_v8  ;;  %237 = vmatpush.msra.mxu3 %v83_v8  ;;  %v64_v32 = vld [vmem:[#allocation5 + $0x10] sm:$0xff]  ;;  %v62_v33 = vld [vmem:[#allocation5] sm:$0xff] }
  0x1b   :  { %105 = vmatpush.msra.mxu0 %v82_v13  ;;  %221 = vmatpush.msra.mxu2 %v82_v13  ;;  %v94_v34 = vld [vmem:[#allocation7] sm:$0x3] }
  0x1c   :  { %129 = vmatpush.msra.mxu1 %v81_v10  ;;  %238 = vmatpush.msra.mxu3 %v81_v10  ;;  %v97_v35 = vperm.slane %v94_v34, 1  ;;  %v96_v44 = vperm.slane %v94_v34, 0 }
  0x1d   :  { %106 = vmatpush.msra.mxu0 %v80_v15  ;;  %222 = vmatpush.msra.mxu2 %v80_v15 }
  0x1e   :  { %130 = vmatpush.msra.mxu1 %v79_v12  ;;  %239 = vmatpush.msra.mxu3 %v79_v12 }
  0x1f   :  { %107 = vmatpush.msra.mxu0 %v78_v17  ;;  %223 = vmatpush.msra.mxu2 %v78_v17 }
  0x20   :  { %131 = vmatpush.msra.mxu1 %v77_v14  ;;  %240 = vmatpush.msra.mxu3 %v77_v14 }
  0x21   :  { %108 = vmatpush.msra.mxu0 %v76_v19  ;;  %224 = vmatpush.msra.mxu2 %v76_v19 }
  0x22   :  { %132 = vmatpush.msra.mxu1 %v75_v16  ;;  %241 = vmatpush.msra.mxu3 %v75_v16 }
  0x23   :  { %109 = vmatpush.msra.mxu0 %v74_v21  ;;  %225 = vmatpush.msra.mxu2 %v74_v21 }
  0x24   :  { %133 = vmatpush.msra.mxu1 %v73_v18  ;;  %242 = vmatpush.msra.mxu3 %v73_v18 }
  0x25   :  { %110 = vmatpush.msra.mxu0 %v72_v23  ;;  %226 = vmatpush.msra.mxu2 %v72_v23 }
  0x26   :  { %134 = vmatpush.msra.mxu1 %v71_v20  ;;  %243 = vmatpush.msra.mxu3 %v71_v20 }
  0x27   :  { %111 = vmatpush.msra.mxu0 %v70_v25  ;;  %227 = vmatpush.msra.mxu2 %v70_v25 }
  0x28   :  { %135 = vmatpush.msra.mxu1 %v69_v22  ;;  %244 = vmatpush.msra.mxu3 %v69_v22 }
  0x29   :  { %112 = vmatpush.msra.mxu0 %v68_v27  ;;  %228 = vmatpush.msra.mxu2 %v68_v27 }
  0x2a   :  { %136 = vmatpush.msra.mxu1 %v67_v24  ;;  %245 = vmatpush.msra.mxu3 %v67_v24 }
  0x2b   :  { %113 = vmatpush.msra.mxu0 %v66_v31  ;;  %229 = vmatpush.msra.mxu2 %v66_v31 }
  0x2c   :  { %137 = vmatpush.msra.mxu1 %v65_v26  ;;  %246 = vmatpush.msra.mxu3 %v65_v26 }
  0x2d   :  { %114 = vmatpush.msra.mxu0 %v64_v32  ;;  %230 = vmatpush.msra.mxu2 %v64_v32 }
  0x2e   :  { %138 = vmatpush.msra.mxu1 %v63_v28  ;;  %247 = vmatpush.msra.mxu3 %v63_v28 }
  0x2f   :  { %139 = vmatmul.f32.vlgmr.msra.gmra.mxu1 %v406_v29  ;;  %142 = vmatmul.f32.vlgmr.msra.gmra.mxu3 %v408_v30 }
  0x30   :  { %115 = vmatpush.msra.mxu0 %v62_v33  ;;  %231 = vmatpush.msra.mxu2 %v62_v33 }
  0x31   :  { %116 = vmatmul.f32.vlgmr.msra.gmra.mxu0 %v406_v29  ;;  %119 = vmatmul.f32.vlgmr.msra.gmra.mxu2 %v408_v30 }
  0xac   :  { %v140_v36 = vpop.f32.mrf.mxu1 }
  0xad   :  { %v141_v37 = vadd.f32 %v140_v36, %v97_v35 }
  0xae   :  { %v117_v45 = vpop.f32.mrf.mxu0 }
  0xaf   :  { %v214_v38 = vmul.f32 -1.442695, %v141_v37  ;;  %v118_v48 = vadd.f32 %v117_v45, %v96_v44 }
  0xb1   :  { %256 = vpow2.f32 %v214_v38  ;;  %v184_v53 = vmax.f32 %v118_v48, 0.0 }
  0xb2   :  { %v143_v39 = vpop.f32.mrf.mxu3 }
  0xb3   :  { %v144_v40 = vadd.f32 %v143_v39, %v97_v35  ;;  %v186_v61 = vsub.f32 %v184_v53, %v406_v29 }
  0xb4   :  { %v120_v51 = vpop.f32.mrf.mxu2 }
  0xb5   :  { %v215_v41 = vmul.f32 -1.442695, %v144_v40  ;;  %v121_v55 = vadd.f32 %v120_v51, %v96_v44 }
  0xb7   :  { %v257_v42 = vpop.eup %256  ;;  %258 = vpow2.f32 %v215_v41  ;;  %v185_v1 = vmax.f32 %v121_v55, 0.0 }
  0xb8   :  { %v152_v43 = vadd.f32 1.0, %v257_v42 }
  0xb9   :  { %v187_v9 = vsub.f32 %v185_v1, %v408_v30 }
  0xba   :  { %260 = vrcp.f32 %v152_v43  ;;  %v165_v54 = vand.u32 2147483648, %v152_v43  ;;  %vm159_vm0 = vweird.f32 %v152_v43  ;;  %v163_v57 = vand.u32 2147483647, %v152_v43 }
  0xbc   :  { %v166_v62 = vor.u32 1.1754944e-38, %v165_v54  ;;  %vm164_vm3 = vcmp.eq.f32.partialorder %v163_v57, 8.507059e+37 }
  0xbd   :  { %v259_v46 = vpop.eup %258 }
  0xbe   :  { %v153_v47 = vadd.f32 1.0, %v259_v46 }
  0xc0   :  { %v261_v49 = vpop.eup %260  ;;  %262 = vrcp.f32 %v153_v47  ;;  %v180_v3 = vand.u32 2147483648, %v153_v47  ;;  %v178_v6 = vand.u32 2147483647, %v153_v47  ;;  %vm174_vm5 = vweird.f32 %v153_v47 }
  0xc1   :  { %v155_v50 = vmul.f32 %v261_v49, %v152_v43  ;;  %vm160_vm1 = vweird.f32 %v261_v49 }
  0xc2   :  { %vm161_vm2 = vmor %vm159_vm0, %vm160_vm1  ;;  %v181_v10 = vor.u32 1.1754944e-38, %v180_v3  ;;  %vm179_vm7 = vcmp.eq.f32.partialorder %v178_v6, 8.507059e+37 }
  0xc3   :  { %v156_v52 = vsub.f32 1.0, %v155_v50 }
  0xc5   :  { %v157_v56 = vmul.f32 %v261_v49, %v156_v52 }
  0xc6   :  { %v263_v58 = vpop.eup %262 }
  0xc7   :  { %v170_v59 = vmul.f32 %v263_v58, %v153_v47  ;;  %v158_v60 = vadd.f32 %v261_v49, %v157_v56  ;;  %vm175_vm4 = vweird.f32 %v263_v58 }
  0xc8   :  { %vm176_vm6 = vmor %vm174_vm5, %vm175_vm4 }
  0xc9   :  { %v171_v63 = vsub.f32 1.0, %v170_v59  ;;  %v162_v0 = vsel %vm161_vm2, %v261_v49, %v158_v60 }
  0xca   :  { %v167_v2 = vsel %vm164_vm3, %v166_v62, %v162_v0 }
  0xcb   :  { %v188_v4 = vmul.f32 %v186_v61, %v167_v2  ;;  %v172_v5 = vmul.f32 %v263_v58, %v171_v63 }
  0xcd   :  { %v190_v7 = vadd.f32 %v188_v4, %v406_v29  ;;  %v173_v8 = vadd.f32 %v263_v58, %v172_v5 }
  0xcf   :  { %192 = vst [vmem:[#allocation8] sm:$0xff] %v190_v7  ;;  %v177_v11 = vsel %vm176_vm6, %v263_v58, %v173_v8 }
  0xd0   :  { %v182_v12 = vsel %vm179_vm7, %v181_v10, %v177_v11 }
  0xd1   :  { %v189_v13 = vmul.f32 %v187_v9, %v182_v12 }
  0xd3   :  { %v191_v14 = vadd.f32 %v189_v13, %v408_v30 }
  0xd5   :  { %193 = vst [vmem:[#allocation8 + $0x8] sm:$0xff] %v191_v14 }
  0xd6   :  { %206 = dma.vmem_to_hbm [thread:$0]  %s199_s29, 256, %s201_s5, [#allocation4], %s370_s24, %s370_s24, %s371_s25  }
  0xd7   :  { %364 = dma.done.wait [#allocation4], 256  }
  0xd8   :  { %365 = vsyncadd [#allocation4], 4294967040 }
  0xd9   :  { %211 = vsyncpa [#allocation3], 1 }
  0xda   :  { %212 = vsyncpa [#allocation6], 1 }
  0xdb   :  { %213 = vsyncpa [#allocation4], 1 }

</bundles_post_ra>
